<compile_context>
chip_gen: v7x
topology: tpu7x:2x2x1
jax: 0.10.0
libtpu: 0.0.40
codegen_flags: <defaults>
</compile_context>

<pallas_src>
import functools

import jax
import jax.numpy as jnp
from jax.experimental import pallas as pl
from jax.experimental.pallas import tpu as pltpu

LANES = 128
SUBLANES = 8
TARGET_BLOCK_BYTES = 8 << 20      # ~8 MiB per streamed input block
SMALL_INPUT_BYTES = 512 << 10     # below this, a fused XLA reduce beats a launch


def _cdiv(a, b):
    return -(-a // b)


def _round_up(x, m):
    return ((x + m - 1) // m) * m


def _tensorcores_per_device():
    """2 for dual-TensorCore chips (v7x); 1 for single-TC v5e/v6e."""
    try:
        d = jax.devices()[0]
        if getattr(d, "platform", "") != "tpu":
            return 1
        kind = str(getattr(d, "device_kind", "")).lower()
        if "v7" in kind:
            return 2
    except Exception:
        pass
    return 1


def _sumsq_kernel(x_ref, o_ref, acc_ref, *, rows, tile_rows, steps_per_core,
                  need_mask):
    c = pl.program_id(0)   # core / row-range shard
    k = pl.program_id(1)   # reduction step within the shard

    @pl.when(k == 0)
    def _init():
        acc_ref[...] = jnp.zeros_like(acc_ref)

    def accum(masked):
        x = x_ref[...].astype(jnp.float32)
        if masked:
            row0 = (c * steps_per_core + k) * tile_rows
            local = jax.lax.broadcasted_iota(jnp.int32, (tile_rows, LANES), 0)
            x = jnp.where(row0 + local < rows, x, 0.0)
        sq = x * x
        # Fold the tile down to one (8, 128) vreg of partial sums: pure VPU
        # add-tree across vregs (no per-step XLU scalar reduce).
        acc_ref[...] += jnp.sum(
            sq.reshape(tile_rows // SUBLANES, SUBLANES, LANES), axis=0)

    if need_mask:
        # Only tiles that overrun `rows` pay the masking cost; all other tiles
        # use the unmasked fast path.
        t = c * steps_per_core + k
        is_tail = (t + 1) * tile_rows > rows
        pl.when(jnp.logical_not(is_tail))(lambda: accum(False))
        pl.when(is_tail)(lambda: accum(True))
    else:
        accum(False)

    @pl.when(k == pl.num_programs(1) - 1)
    def _finalize():
        o_ref[...] = acc_ref[...]


def activity_regularization(activations, coefficient=1.0, use_pallas=None,
                            target_block_bytes=TARGET_BLOCK_BYTES):
    """mean(activations ** 2) * coefficient; the reduction runs in Pallas."""
    n_elements = activations.size
    itemsize = activations.dtype.itemsize
    if use_pallas is None:
        use_pallas = n_elements * itemsize >= SMALL_INPUT_BYTES

    if not use_pallas or n_elements == 0:
        # Small-activation fast path: launch + pipeline prologue would dominate.
        mean_sq = jnp.mean(activations.astype(jnp.float32) ** 2)
        return mean_sq * jnp.float32(coefficient)

    flat = activations.reshape(-1)            # original dtype, no upcast copy
    if flat.shape[0] % LANES != 0:
        # TODO(synk): rare non-multiple-of-128 sizes take one small zero-pad
        # copy; 128-aligned activations stream with no wrapper-side copy.
        flat = jnp.pad(flat, (0, LANES - flat.shape[0] % LANES))
    rows = flat.shape[0] // LANES
    x2d = flat.reshape(rows, LANES)           # lane-dense slab

    num_cores = _tensorcores_per_device()

    # Dtype-aware block sizing (~target_block_bytes per block), balanced across
    # cores so no core gets a fully-out-of-range tile.
    tile_rows_max = max(
        SUBLANES,
        (target_block_bytes // (LANES * itemsize)) // SUBLANES * SUBLANES)
    per_core_rows = _cdiv(rows, num_cores)
    steps_per_core = _cdiv(per_core_rows, tile_rows_max)
    tile_rows = _round_up(_cdiv(per_core_rows, steps_per_core), SUBLANES)
    n_real_tiles = _cdiv(rows, tile_rows)
    need_mask = (num_cores * steps_per_core * tile_rows) != rows

    def x_index_map(c, k):
        t = c * steps_per_core + k
        # Safety-net clamp for tiny forced inputs; with the balanced tiling
        # above it never triggers for real (>= SMALL_INPUT_BYTES) workloads.
        return (jnp.minimum(t, n_real_tiles - 1), 0)

    kernel = functools.partial(
        _sumsq_kernel,
        rows=rows,
        tile_rows=tile_rows,
        steps_per_core=steps_per_core,
        need_mask=need_mask,
    )

    block_bytes = tile_rows * LANES * itemsize
    # 2x double-buffered input + small output/scratch headroom; fits v5e's
    # 16 MiB default scoped VMEM floor and v7x's 64 MiB physical VMEM.
    vmem_limit = int(min(112 << 20, max(16 << 20, 2 * block_bytes + (2 << 20))))

    partials = pl.pallas_call(
        kernel,
        out_shape=jax.ShapeDtypeStruct((num_cores * SUBLANES, LANES),
                                       jnp.float32),
        grid_spec=pltpu.PrefetchScalarGridSpec(
            num_scalar_prefetch=0,
            grid=(num_cores, steps_per_core),
            in_specs=[pl.BlockSpec((tile_rows, LANES), x_index_map)],
            out_specs=pl.BlockSpec((SUBLANES, LANES), lambda c, k: (c, 0)),
            scratch_shapes=[pltpu.VMEM((SUBLANES, LANES), jnp.float32)],
        ),
        compiler_params=pltpu.CompilerParams(
            dimension_semantics=("parallel", "arbitrary"),
            vmem_limit_bytes=vmem_limit,
        ),
        cost_estimate=pl.CostEstimate(
            flops=2 * rows * LANES,
            transcendentals=0,
            bytes_accessed=rows * LANES * itemsize
            + num_cores * SUBLANES * LANES * 4,
        ),
    )(x2d)

    # Tiny final reduction + scalar glue in plain JAX.
    sumsq = jnp.sum(partials, dtype=jnp.float32)
    mean_sq = sumsq / jnp.float32(n_elements)
    return mean_sq * jnp.float32(coefficient)


if __name__ == "__main__":
    key = jax.random.PRNGKey(0)
    k1, k2 = jax.random.split(key)
    coefficient = 0.5

    # Synthetic "hooked activations" from some conv-like module, NCHW.
    # (1) Small input via the auto path (plain-JAX fast path).
    x = jax.random.normal(key, (2, 4, 16, 16), dtype=jnp.float32)
    out = jax.block_until_ready(activity_regularization(x, coefficient=coefficient))
    ref = jnp.mean(x.astype(jnp.float32) ** 2) * coefficient
    assert jnp.allclose(out, ref, rtol=1e-5, atol=1e-6), (out, ref)

    # (2) Same small input with the Pallas kernel forced (covers tiny shapes).
    out_k = jax.block_until_ready(
        activity_regularization(x, coefficient=coefficient, use_pallas=True))
    assert jnp.allclose(out_k, ref, rtol=1e-5, atol=1e-6), (out_k, ref)

    # (3) Non-multiple-of-128 element count: exercises pad + tail masking.
    x_odd = jax.random.normal(k1, (3, 5, 7, 11), dtype=jnp.float32)
    out_odd = jax.block_until_ready(
        activity_regularization(x_odd, coefficient=1.25, use_pallas=True))
    ref_odd = jnp.mean(x_odd.astype(jnp.float32) ** 2) * 1.25
    assert jnp.allclose(out_odd, ref_odd, rtol=1e-5, atol=1e-6), (out_odd, ref_odd)

    # (4) Larger bf16 activations; small block cap forces a multi-step grid so
    #     the accumulate/init/finalize pipeline path is exercised.
    x_big = jax.random.normal(k2, (8, 32, 32, 32), dtype=jnp.bfloat16)
    out_big = jax.block_until_ready(
        activity_regularization(x_big, coefficient=1.25,
                                target_block_bytes=128 << 10))
    ref_big = jnp.mean(x_big.astype(jnp.float32) ** 2) * 1.25
    assert jnp.allclose(out_big, ref_big, rtol=1e-4, atol=1e-5), (out_big, ref_big)

    print("KERNEL_OK")
</pallas_src>

<mosaic_0001>
module attributes {stable_mosaic.version = 11 : i64} {
  func.func @_sumsq_kernel(%arg0: i32, %arg1: i32, %arg2: memref<16x128xf32, #tpu.memory_space<vmem>>, %arg3: memref<8x128xf32, #tpu.memory_space<vmem>>, %arg4: memref<8x128xf32, #tpu.memory_space<vmem>>) attributes {dimension_semantics = [#tpu.dimension_semantics<parallel>, #tpu.dimension_semantics<arbitrary>], iteration_bounds = array<i64: 1, 1>, scalar_prefetch = 0 : i64, scratch_operands = 1 : i64, tpu.core_type = #tpu.core_type<tc>, window_params = [{transform_indices = @transform_0, window_bounds = array<i64: 16, 128>}, {transform_indices = @transform_1, window_bounds = array<i64: 8, 128>}]} {
    %c0_i32 = arith.constant 0 : i32
    %0 = arith.cmpi eq, %arg1, %c0_i32 : i32
    %1 = arith.extui %0 : i1 to i32
    %c0_i32_0 = arith.constant 0 : i32
    %2 = arith.cmpi ne, %1, %c0_i32_0 : i32
    scf.if %2 {
      %cst_8 = arith.constant 0.000000e+00 : f32
      %13 = vector.broadcast %cst_8 : f32 to vector<8x128xf32>
      %c0_9 = arith.constant 0 : index
      %c0_10 = arith.constant 0 : index
      %14 = vector.load %arg4[%c0_9, %c0_10] : memref<8x128xf32, #tpu.memory_space<vmem>>, vector<8x128xf32>
      tpu.vector_store %arg4[%c0_9, %c0_10], %13 {strides = array<i32>} : memref<8x128xf32, #tpu.memory_space<vmem>>, vector<8x128xf32>,
    } else {
    }
    %c0 = arith.constant 0 : index
    %c0_1 = arith.constant 0 : index
    %3 = vector.load %arg2[%c0, %c0_1] : memref<16x128xf32, #tpu.memory_space<vmem>>, vector<16x128xf32>
    %4 = arith.mulf %3, %3 : vector<16x128xf32>
    %c0_2 = arith.constant 0 : index
    %c0_3 = arith.constant 0 : index
    %5 = vector.load %arg4[%c0_2, %c0_3] : memref<8x128xf32, #tpu.memory_space<vmem>>, vector<8x128xf32>
    %6 = vector.shape_cast %4 : vector<16x128xf32> to vector<2x8x128xf32>
    %cst = arith.constant dense<0.000000e+00> : vector<8x128xf32>
    %7 = vector.multi_reduction <add>, %6, %cst [0] : vector<2x8x128xf32> to vector<8x128xf32>
    %8 = arith.addf %5, %7 : vector<8x128xf32>
    %c0_4 = arith.constant 0 : index
    %c0_5 = arith.constant 0 : index
    %9 = vector.load %arg4[%c0_4, %c0_5] : memref<8x128xf32, #tpu.memory_space<vmem>>, vector<8x128xf32>
    tpu.vector_store %arg4[%c0_4, %c0_5], %8 {strides = array<i32>} : memref<8x128xf32, #tpu.memory_space<vmem>>, vector<8x128xf32>,
    %c0_i32_6 = arith.constant 0 : i32
    %10 = arith.cmpi eq, %arg1, %c0_i32_6 : i32
    %11 = arith.extui %10 : i1 to i32
    %c0_i32_7 = arith.constant 0 : i32
    %12 = arith.cmpi ne, %11, %c0_i32_7 : i32
    scf.if %12 {
      %c0_8 = arith.constant 0 : index
      %c0_9 = arith.constant 0 : index
      %13 = vector.load %arg4[%c0_8, %c0_9] : memref<8x128xf32, #tpu.memory_space<vmem>>, vector<8x128xf32>
      %c0_10 = arith.constant 0 : index
      %c0_11 = arith.constant 0 : index
      %14 = vector.load %arg3[%c0_10, %c0_11] : memref<8x128xf32, #tpu.memory_space<vmem>>, vector<8x128xf32>
      tpu.vector_store %arg3[%c0_10, %c0_11], %13 {strides = array<i32>} : memref<8x128xf32, #tpu.memory_space<vmem>>, vector<8x128xf32>,
    } else {
    }
    return
  }
  func.func @transform_0(%arg0: i32, %arg1: i32) -> (i32, i32) {
    %c1_i32 = arith.constant 1 : i32
    %0 = arith.muli %arg0, %c1_i32 : i32
    %1 = arith.addi %0, %arg1 : i32
    %c0_i32 = arith.constant 0 : i32
    %2 = arith.minsi %1, %c0_i32 : i32
    %c0_i32_0 = arith.constant 0 : i32
    %c0_i32_1 = arith.constant 0 : i32
    return %2, %c0_i32_0 : i32, i32
  }
  func.func @transform_1(%arg0: i32, %arg1: i32) -> (i32, i32) {
    %c0_i32 = arith.constant 0 : i32
    %c0_i32_0 = arith.constant 0 : i32
    return %arg0, %c0_i32 : i32, i32
  }
}

</mosaic_0001>

<bundles_post_ra>
// kernel: tpu_custom_call.1
= control target key start
LH: loop header
LB: loop body
LE: loop exit
PB: predicated region body
PF: predicated region fallthrough
CT: control target
= control target key end

     0   :  { %6 = vsyncpa [#allocation4], 0  ;;  %s158_s0 = inlined_call_operand.hbm [shape: f32[16,128], index: 0, kind: input, shape index: {}]   ;;  %s159_s1 = inlined_call_operand.hbm [shape: f32[8,128], index: 1, kind: output, shape index: {}]  }
   0x1   :  { %7 = vsyncpa [#allocation5], 0  ;;  %s120_s6 = smov [#allocation3]   ;;  %s72_s10 = scalar_lea.hbm %s158_s0, 256 }
   0x2   :  { %s19_s7 = sshll.u32 %s120_s6, 4  ;;  %p73_p0 = scmp.ne.s32.totalorder %s158_s0, %s72_s10  ;;  %s20_s7 = int_to_ptr.vmem [resolvable:$true] %s19_s7 }
   0x3   :  { %p76_p1 = scmp.lt.u32.totalorder %s72_s10, %s158_s0 }
   0x5   :  { %p78_p2 = pnand %p76_p1, %p73_p0 }
   0x7   :  { %81 = shalt.err (!%p78_p2)
}
   0x8   :  { %s82_s15 = scalar_lea.vmem %s20_s7, 256  ;;  %p87_p4 = scmp.lt.s32.totalorder %s20_s7, %s20_s7 }
   0x9   :  { %p83_p3 = scmp.ne.s32.totalorder %s20_s7, %s82_s15  ;;  %p88_p5 = scmp.lt.s32.totalorder %s82_s15, %s82_s15 }
   0xb   :  { %p89_p6 = por %p88_p5, %p87_p4 }
   0xd   :  { %p90_p7 = pnand %p89_p6, %p83_p3 }
   0xf   :  { %93 = shalt.err (!%p90_p7)
}
  0x10   :  { %s121_s16 = smov 128   ;;  %s122_s17 = smov 8  }
  0x11   :  { %25 = dma.hbm_to_vmem [thread:$0]  %s158_s0, 256, %s20_s7, [#allocation4], %s121_s16, %s121_s16, %s122_s17  }
  0x12   :  { %116 = dma.done.wait [#allocation4], 256  }
  0x13   :  { %117 = vsyncadd [#allocation4], 4294967040  ;;  %v38_v0 = vld [vmem:[#allocation3] sm:$0xff]  ;;  %v39_v1 = vld [vmem:[#allocation3 + $0x8] sm:$0xff]  ;;  %s123_s20 = smov [#allocation6]  }
  0x14   :  { %s57_s21 = sshll.u32 %s123_s20, 4  ;;  %v40_v2 = vmul.f32 %v38_v0, %v38_v0  ;;  %v41_v3 = vmul.f32 %v39_v1, %v39_v1  ;;  %s58_s21 = int_to_ptr.vmem [resolvable:$true] %s57_s21 }
  0x15   :  { %s94_s22 = scalar_lea.vmem %s58_s21, 128  ;;  %p99_p9 = scmp.lt.s32.totalorder %s58_s21, %s58_s21 }
  0x16   :  { %v43_v4 = vadd.f32 %v41_v3, %v40_v2  ;;  %p95_p8 = scmp.ne.s32.totalorder %s58_s21, %s94_s22  ;;  %p100_p10 = scmp.lt.s32.totalorder %s94_s22, %s94_s22 }
  0x18   :  { %50 = vst [vmem:[#allocation6] sm:$0xff] %v43_v4  ;;  %p101_p11 = por %p100_p10, %p99_p9 }
  0x1a   :  { %p102_p12 = pnand %p101_p11, %p95_p8 }
  0x1c   :  { %105 = shalt.err (!%p102_p12)
}
  0x1d   :  { %s106_s24 = scalar_lea.hbm %s159_s1, 128 }
  0x1e   :  { %p107_p13 = scmp.ne.s32.totalorder %s159_s1, %s106_s24  ;;  %p110_p0 = scmp.lt.u32.totalorder %s106_s24, %s159_s1 }
  0x20   :  { %p112_p1 = pnand %p110_p0, %p107_p13 }
  0x22   :  { %115 = shalt.err (!%p112_p1)
}
  0x23   :  { %60 = dma.vmem_to_hbm [thread:$0]  %s58_s21, 128, %s159_s1, [#allocation5]  }
  0x24   :  { %118 = dma.done.wait [#allocation5], 128  }
  0x25   :  { %119 = vsyncadd [#allocation5], 4294967168 }
  0x26   :  { %64 = vsyncpa [#allocation4], 1 }
  0x27   :  { %65 = vsyncpa [#allocation5], 1 }

</bundles_post_ra>
